<compile_context>
chip_gen: v7x
topology: tpu7x:2x2x1
jax: 0.10.0
libtpu: 0.0.40
codegen_flags: <defaults>
</compile_context>

<pallas_src>
import functools

import jax
import jax.numpy as jnp
from jax.experimental import pallas as pl
from jax.experimental.pallas import tpu as pltpu

EPS = 1e-3
_LANES = 128
_ROW_ALIGN = 32          # 1-byte mask packs (32, 128) sublane tiles -> rows % 32 == 0
_MAX_TILE_ROWS = 2048    # 2048 x 128 f32 tile = 1 MiB; whole kernel well under VMEM
_NUM_CORES = 2           # v7x has 2 TensorCores; on v5e/v6e the split is sequential
_CORE_SPLIT_MIN_TILES = 4  # don't split tiny grids across cores


def _tile_stats(pred_ref, gt_ref, mask_ref, *, max_depth, fold, acc_rows,
                row_limit=None):
    """Per-tile partial sums (count, sum_g, sum_g2), each (acc_rows, LANES).

    Processes the tile in `fold` sub-slabs and adds them together before the
    caller touches the accumulators (acc load/store amortized by `fold`).
    `row_limit` (static) masks stale rows of a partial boundary tile; slabs
    entirely past the limit are skipped statically, slabs entirely inside it
    need no row mask at all.
    """
    cnt = sg = sg2 = None
    for f in range(fold):
        r0 = f * acc_rows
        if row_limit is not None and r0 >= row_limit:
            continue  # slab is entirely stale / padding rows
        pred = pred_ref[r0:r0 + acc_rows, :].astype(jnp.float32)
        gt = gt_ref[r0:r0 + acc_rows, :].astype(jnp.float32)

        valid = jnp.logical_and(mask_ref[r0:r0 + acc_rows, :] != 0, gt > 0.0)
        if max_depth is not None:
            valid = jnp.logical_and(valid, gt <= max_depth)
        if row_limit is not None and (r0 + acc_rows) > row_limit:
            rows_here = (jax.lax.broadcasted_iota(jnp.int32, (acc_rows, _LANES), 0)
                         + r0)
            valid = jnp.logical_and(valid, rows_here < row_limit)

        # Logs depend only on the loaded values, so the EUP pushes issue early
        # and overlap the mask VALU work. Invalid lanes may produce NaN/Inf
        # here; the select below zeroes them before they reach any sum.
        g = jnp.log(pred + EPS) - jnp.log(gt + EPS)
        g = jnp.where(valid, g, 0.0)
        c = valid.astype(jnp.float32)
        g2 = g * g

        cnt = c if cnt is None else cnt + c
        sg = g if sg is None else sg + g
        sg2 = g2 if sg2 is None else sg2 + g2
    return cnt, sg, sg2


def _stats_kernel(pred_ref, gt_ref, mask_ref, out_ref,
                  acc_cnt, acc_sg, acc_sg2,
                  *, max_depth, fold, acc_rows, num_full_tiles, rem_rows,
                  tiles_per_core):
    core = pl.program_id(0)
    step = pl.program_id(1)
    tile_idx = core * tiles_per_core + step

    @pl.when(step == 0)
    def _():
        acc_cnt[...] = jnp.zeros_like(acc_cnt)
        acc_sg[...] = jnp.zeros_like(acc_sg)
        acc_sg2[...] = jnp.zeros_like(acc_sg2)

    # Fast path: full tiles, no row masking at all.
    @pl.when(tile_idx < num_full_tiles)
    def _():
        c, s1, s2 = _tile_stats(pred_ref, gt_ref, mask_ref,
                                max_depth=max_depth, fold=fold,
                                acc_rows=acc_rows, row_limit=None)
        acc_cnt[...] += c
        acc_sg[...] += s1
        acc_sg2[...] += s2

    # Slow path: the single partial boundary tile (static row limit).
    if rem_rows:
        @pl.when(tile_idx == num_full_tiles)
        def _():
            c, s1, s2 = _tile_stats(pred_ref, gt_ref, mask_ref,
                                    max_depth=max_depth, fold=fold,
                                    acc_rows=acc_rows, row_limit=rem_rows)
            acc_cnt[...] += c
            acc_sg[...] += s1
            acc_sg2[...] += s2

    # Replay tiles from the ragged core split (tile_idx >= total tiles) match
    # neither branch above: their whole accumulation body is skipped.

    # Single cross-lane reduce + scalar SMEM store per core, on its last step.
    @pl.when(step == tiles_per_core - 1)
    def _():
        out_ref[0, 0] = jnp.sum(acc_cnt[...])
        out_ref[0, 1] = jnp.sum(acc_sg[...])
        out_ref[0, 2] = jnp.sum(acc_sg2[...])


@functools.partial(jax.jit, static_argnames=("max_depth",))
def _masked_sig_stats(depth_pred, depth_gt, obj_mask, *, max_depth):
    """Returns (count, sum_g, sum_g2) over valid elements via a Pallas kernel."""
    pred = depth_pred.reshape(-1)      # native dtype; widened in-kernel
    gt = depth_gt.reshape(-1)
    if obj_mask.dtype == jnp.int8 or obj_mask.dtype == jnp.uint8:
        mask = obj_mask.reshape(-1)    # stream the OpenCV-style mask as-is
    else:
        # TODO(synk): bool / wide-dtype masks pay one extra cast pass in HBM.
        mask = (obj_mask != 0).astype(jnp.uint8).reshape(-1)

    n = pred.shape[0]
    align = _ROW_ALIGN * _LANES                     # 4096 elements
    padded = ((n + align - 1) // align) * align
    pad = padded - n
    if pad:
        # Only hit when n % 4096 != 0 (typical image sizes need no pad).
        pred = jnp.pad(pred, (0, pad))
        gt = jnp.pad(gt, (0, pad))                  # pad gt == 0   -> invalid
        mask = jnp.pad(mask, (0, pad))              # pad mask == 0 -> invalid

    rows = padded // _LANES                         # multiple of 32
    pred2 = pred.reshape(rows, _LANES)
    gt2 = gt.reshape(rows, _LANES)
    mask2 = mask.reshape(rows, _LANES)

    tile_rows = min(_MAX_TILE_ROWS, rows)           # multiple of 32
    num_full_tiles = rows // tile_rows
    rem_rows = rows - num_full_tiles * tile_rows    # multiple of 32, < tile_rows
    tiles = num_full_tiles + (1 if rem_rows else 0)

    num_cores = _NUM_CORES if tiles >= _CORE_SPLIT_MIN_TILES else 1
    tiles_per_core = (tiles + num_cores - 1) // num_cores

    # 4-way accumulator fold; sub-slab starts must stay on 32-row boundaries
    # so every dtype's packed tiling ((8|16|32) x 128) is respected.
    fold = 4 if tile_rows % (4 * _ROW_ALIGN) == 0 else 1
    acc_rows = tile_rows // fold

    def in_index(c, i):
        # Clamp so the ragged core-split's extra iteration re-reads the last
        # real block; its accumulation body is skipped in-kernel.
        return (jnp.minimum(c * tiles_per_core + i, tiles - 1), 0)

    in_spec = pl.BlockSpec((tile_rows, _LANES), in_index)
    out_spec = pl.BlockSpec((1, 3), lambda c, i: (c, 0),
                            memory_space=pltpu.SMEM)

    kernel = functools.partial(
        _stats_kernel, max_depth=max_depth, fold=fold, acc_rows=acc_rows,
        num_full_tiles=num_full_tiles, rem_rows=rem_rows,
        tiles_per_core=tiles_per_core)

    partials = pl.pallas_call(
        kernel,
        out_shape=jax.ShapeDtypeStruct((num_cores, 3), jnp.float32),
        grid_spec=pltpu.PrefetchScalarGridSpec(
            num_scalar_prefetch=0,
            grid=(num_cores, tiles_per_core),
            in_specs=[in_spec, in_spec, in_spec],
            out_specs=out_spec,
            scratch_shapes=[pltpu.VMEM((acc_rows, _LANES), jnp.float32)] * 3,
        ),
        compiler_params=pltpu.CompilerParams(
            dimension_semantics=("parallel", "arbitrary"),
            vmem_limit_bytes=32 * 1024 * 1024),
    )(pred2, gt2, mask2)

    cnt = jnp.sum(partials[:, 0])
    sg = jnp.sum(partials[:, 1])
    sg2 = jnp.sum(partials[:, 2])
    return cnt, sg, sg2


class MaskedSigLoss:
    """JAX/Pallas port of the PyTorch MaskedSigLoss (forward only)."""

    def __init__(self, valid_mask=True, loss_weight=1.0, max_depth=None,
                 warm_up=False, warm_iter=100, loss_name='masked_sigloss'):
        if not valid_mask:
            # TODO(synk): valid_mask=False (keep obj-mask-zeroed elements and
            #             their log(eps) terms) is not wired through the kernel.
            raise NotImplementedError("valid_mask=False is not supported")
        self.valid_mask = valid_mask
        self.loss_weight = loss_weight
        self.max_depth = max_depth
        self.loss_name = loss_name
        self.eps = EPS
        self.warm_up = warm_up
        self.warm_iter = warm_iter
        self.warm_up_counter = 0  # Python-side state, as in the PyTorch module

    def masked_sigloss(self, depth_pred, depth_gt, obj_mask):
        cnt, sg, sg2 = _masked_sig_stats(depth_pred, depth_gt, obj_mask,
                                         max_depth=self.max_depth)
        # Precondition (same as the PyTorch module): at least 2 valid pixels;
        # cnt <= 1 yields NaN here exactly as torch.mean/torch.var would.
        mean = sg / cnt
        if self.warm_up and self.warm_up_counter < self.warm_iter:
            # TODO(synk): Python-side warm-up counter; under jax.jit this branch
            #             is resolved at trace time, unlike the PyTorch module.
            self.warm_up_counter += 1
            return jnp.sqrt(0.15 * mean * mean)
        # torch.var defaults to the unbiased (n-1) estimator.
        # NOTE: one-pass variance (sum(g^2) - sum(g)^2/n) in f32 can lose
        # precision for huge valid counts with tiny variance; acceptable here.
        var = (sg2 - sg * sg / cnt) / (cnt - 1.0)
        dg = var + 0.15 * mean * mean
        return jnp.sqrt(dg)

    def forward(self, depth_pred, depth_gt, img_meta):
        return self.loss_weight * self.masked_sigloss(
            depth_pred, depth_gt, img_meta['obj_mask'])

    __call__ = forward


def _reference_loss(pred, gt, mask, max_depth=None):
    """Pure-JAX two-pass reference (no Pallas)."""
    valid = jnp.logical_and(mask != 0, gt > 0)
    if max_depth is not None:
        valid = jnp.logical_and(valid, gt <= max_depth)
    g = jnp.log(pred.astype(jnp.float32) + EPS) - jnp.log(gt.astype(jnp.float32) + EPS)
    g = jnp.where(valid, g, 0.0)
    n = jnp.sum(valid.astype(jnp.float32))
    mean = jnp.sum(g) / n
    var = jnp.sum(jnp.where(valid, (g - mean) ** 2, 0.0)) / (n - 1.0)
    return jnp.sqrt(var + 0.15 * mean * mean)


def _make_case(key, shape):
    k1, k2, k3 = jax.random.split(key, 3)
    depth_pred = jax.random.uniform(k1, shape, jnp.float32, 0.1, 10.0)
    depth_gt = jax.random.uniform(k2, shape, jnp.float32, 0.0, 10.0)
    obj_mask = (jax.random.uniform(k3, shape) > 0.3).astype(jnp.uint8) * 255
    return depth_pred, depth_gt, obj_mask


if __name__ == "__main__":
    key = jax.random.PRNGKey(0)
    k1, k2, k3 = jax.random.split(key, 3)

    # --- Case 1: small map, no max_depth (single tile, single core) ---------
    pred, gt, m = _make_case(k1, (2, 1, 16, 16))
    loss_mod = MaskedSigLoss(valid_mask=True, loss_weight=1.0, max_depth=None)
    loss1 = loss_mod(pred, gt, {"obj_mask": m})
    jax.block_until_ready(loss1)
    ref1 = _reference_loss(pred, gt, m, max_depth=None)
    assert jnp.allclose(loss1, ref1, rtol=1e-3, atol=1e-6), (loss1, ref1)

    # --- Case 2: typical depth map with max_depth (full tile + partial
    #             boundary tile on the fast/slow two-path split) -------------
    pred, gt, m = _make_case(k2, (2, 1, 320, 512))
    loss_mod2 = MaskedSigLoss(valid_mask=True, loss_weight=1.0, max_depth=8.0)
    loss2 = loss_mod2(pred, gt, {"obj_mask": m})
    jax.block_until_ready(loss2)
    ref2 = _reference_loss(pred, gt, m, max_depth=8.0)
    assert jnp.allclose(loss2, ref2, rtol=1e-3, atol=1e-6), (loss2, ref2)

    # --- Case 3: larger map (2-core split, odd tile count -> skipped replay
    #             iteration, iota-masked partial tail) -----------------------
    pred, gt, m = _make_case(k3, (2, 1, 768, 720))
    loss_mod3 = MaskedSigLoss(valid_mask=True, loss_weight=1.0, max_depth=8.0)
    loss3 = loss_mod3(pred, gt, {"obj_mask": m})
    jax.block_until_ready(loss3)
    ref3 = _reference_loss(pred, gt, m, max_depth=8.0)
    assert jnp.allclose(loss3, ref3, rtol=1e-3, atol=1e-6), (loss3, ref3)

    print("KERNEL_OK")
</pallas_src>

<mosaic_0001>
module attributes {stable_mosaic.version = 11 : i64} {
  func.func @_stats_kernel(%arg0: i32, %arg1: i32, %arg2: memref<32x128xf32, #tpu.memory_space<vmem>>, %arg3: memref<32x128xf32, #tpu.memory_space<vmem>>, %arg4: memref<32x128xi8, #tpu.memory_space<vmem>>, %arg5: memref<1x3xf32, #tpu.memory_space<smem>>, %arg6: memref<32x128xf32, #tpu.memory_space<vmem>>, %arg7: memref<32x128xf32, #tpu.memory_space<vmem>>, %arg8: memref<32x128xf32, #tpu.memory_space<vmem>>) attributes {dimension_semantics = [#tpu.dimension_semantics<parallel>, #tpu.dimension_semantics<arbitrary>], iteration_bounds = array<i64: 1, 1>, scalar_prefetch = 0 : i64, scratch_operands = 3 : i64, tpu.core_type = #tpu.core_type<tc>, window_params = [{transform_indices = @transform_0, window_bounds = array<i64: 32, 128>}, {transform_indices = @transform_1, window_bounds = array<i64: 32, 128>}, {transform_indices = @transform_2, window_bounds = array<i64: 32, 128>}, {transform_indices = @transform_3, window_bounds = array<i64: 1, 3>}]} {
    %c1_i32 = arith.constant 1 : i32
    %0 = arith.muli %arg0, %c1_i32 : i32
    %1 = arith.addi %0, %arg1 : i32
    %c0_i32 = arith.constant 0 : i32
    %2 = arith.cmpi eq, %arg1, %c0_i32 : i32
    %3 = arith.extui %2 : i1 to i32
    %c0_i32_0 = arith.constant 0 : i32
    %4 = arith.cmpi ne, %3, %c0_i32_0 : i32
    scf.if %4 {
      %cst = arith.constant 0.000000e+00 : f32
      %11 = vector.broadcast %cst : f32 to vector<32x128xf32>
      %c0 = arith.constant 0 : index
      %c0_5 = arith.constant 0 : index
      %12 = vector.load %arg6[%c0, %c0_5] : memref<32x128xf32, #tpu.memory_space<vmem>>, vector<32x128xf32>
      tpu.vector_store %arg6[%c0, %c0_5], %11 {strides = array<i32>} : memref<32x128xf32, #tpu.memory_space<vmem>>, vector<32x128xf32>,
      %cst_6 = arith.constant 0.000000e+00 : f32
      %13 = vector.broadcast %cst_6 : f32 to vector<32x128xf32>
      %c0_7 = arith.constant 0 : index
      %c0_8 = arith.constant 0 : index
      %14 = vector.load %arg7[%c0_7, %c0_8] : memref<32x128xf32, #tpu.memory_space<vmem>>, vector<32x128xf32>
      tpu.vector_store %arg7[%c0_7, %c0_8], %13 {strides = array<i32>} : memref<32x128xf32, #tpu.memory_space<vmem>>, vector<32x128xf32>,
      %cst_9 = arith.constant 0.000000e+00 : f32
      %15 = vector.broadcast %cst_9 : f32 to vector<32x128xf32>
      %c0_10 = arith.constant 0 : index
      %c0_11 = arith.constant 0 : index
      %16 = vector.load %arg8[%c0_10, %c0_11] : memref<32x128xf32, #tpu.memory_space<vmem>>, vector<32x128xf32>
      tpu.vector_store %arg8[%c0_10, %c0_11], %15 {strides = array<i32>} : memref<32x128xf32, #tpu.memory_space<vmem>>, vector<32x128xf32>,
    } else {
    }
    %c1_i32_1 = arith.constant 1 : i32
    %5 = arith.cmpi slt, %1, %c1_i32_1 : i32
    %6 = arith.extui %5 : i1 to i32
    %c0_i32_2 = arith.constant 0 : i32
    %7 = arith.cmpi ne, %6, %c0_i32_2 : i32
    scf.if %7 {
      %c0 = arith.constant 0 : index
      %c0_5 = arith.constant 0 : index
      %11 = vector.load %arg2[%c0, %c0_5] : memref<32x128xf32, #tpu.memory_space<vmem>>, vector<32x128xf32>
      %c0_6 = arith.constant 0 : index
      %c0_7 = arith.constant 0 : index
      %12 = vector.load %arg3[%c0_6, %c0_7] : memref<32x128xf32, #tpu.memory_space<vmem>>, vector<32x128xf32>
      %c0_8 = arith.constant 0 : index
      %c0_9 = arith.constant 0 : index
      %13 = vector.load %arg4[%c0_8, %c0_9] : memref<32x128xi8, #tpu.memory_space<vmem>>, vector<32x128xi8>
      %c0_i8 = arith.constant 0 : i8
      %14 = vector.broadcast %c0_i8 : i8 to vector<32x128xi8>
      %15 = arith.cmpi ne, %13, %14 : vector<32x128xi8>
      %cst = arith.constant 0.000000e+00 : f32
      %16 = vector.broadcast %cst : f32 to vector<32x128xf32>
      %17 = arith.cmpf ogt, %12, %16 : vector<32x128xf32>
      %18 = arith.andi %15, %17 : vector<32x128xi1>
      %cst_10 = arith.constant 1.000000e-03 : f32
      %19 = vector.broadcast %cst_10 : f32 to vector<32x128xf32>
      %20 = arith.addf %11, %19 : vector<32x128xf32>
      %21 = math.log %20 : vector<32x128xf32>
      %cst_11 = arith.constant 1.000000e-03 : f32
      %22 = vector.broadcast %cst_11 : f32 to vector<32x128xf32>
      %23 = arith.addf %12, %22 : vector<32x128xf32>
      %24 = math.log %23 : vector<32x128xf32>
      %25 = arith.subf %21, %24 : vector<32x128xf32>
      %cst_12 = arith.constant 0.000000e+00 : f32
      %26 = vector.broadcast %cst_12 : f32 to vector<32x128xf32>
      %27 = arith.select %18, %25, %26 : vector<32x128xi1>, vector<32x128xf32>
      %28 = arith.extui %18 : vector<32x128xi1> to vector<32x128xi32>
      %29 = arith.sitofp %28 : vector<32x128xi32> to vector<32x128xf32>
      %30 = arith.mulf %27, %27 : vector<32x128xf32>
      %c0_13 = arith.constant 0 : index
      %c0_14 = arith.constant 0 : index
      %31 = vector.load %arg6[%c0_13, %c0_14] : memref<32x128xf32, #tpu.memory_space<vmem>>, vector<32x128xf32>
      %32 = arith.addf %31, %29 : vector<32x128xf32>
      %c0_15 = arith.constant 0 : index
      %c0_16 = arith.constant 0 : index
      %33 = vector.load %arg6[%c0_15, %c0_16] : memref<32x128xf32, #tpu.memory_space<vmem>>, vector<32x128xf32>
      tpu.vector_store %arg6[%c0_15, %c0_16], %32 {strides = array<i32>} : memref<32x128xf32, #tpu.memory_space<vmem>>, vector<32x128xf32>,
      %c0_17 = arith.constant 0 : index
      %c0_18 = arith.constant 0 : index
      %34 = vector.load %arg7[%c0_17, %c0_18] : memref<32x128xf32, #tpu.memory_space<vmem>>, vector<32x128xf32>
      %35 = arith.addf %34, %27 : vector<32x128xf32>
      %c0_19 = arith.constant 0 : index
      %c0_20 = arith.constant 0 : index
      %36 = vector.load %arg7[%c0_19, %c0_20] : memref<32x128xf32, #tpu.memory_space<vmem>>, vector<32x128xf32>
      tpu.vector_store %arg7[%c0_19, %c0_20], %35 {strides = array<i32>} : memref<32x128xf32, #tpu.memory_space<vmem>>, vector<32x128xf32>,
      %c0_21 = arith.constant 0 : index
      %c0_22 = arith.constant 0 : index
      %37 = vector.load %arg8[%c0_21, %c0_22] : memref<32x128xf32, #tpu.memory_space<vmem>>, vector<32x128xf32>
      %38 = arith.addf %37, %30 : vector<32x128xf32>
      %c0_23 = arith.constant 0 : index
      %c0_24 = arith.constant 0 : index
      %39 = vector.load %arg8[%c0_23, %c0_24] : memref<32x128xf32, #tpu.memory_space<vmem>>, vector<32x128xf32>
      tpu.vector_store %arg8[%c0_23, %c0_24], %38 {strides = array<i32>} : memref<32x128xf32, #tpu.memory_space<vmem>>, vector<32x128xf32>,
    } else {
    }
    %c0_i32_3 = arith.constant 0 : i32
    %8 = arith.cmpi eq, %arg1, %c0_i32_3 : i32
    %9 = arith.extui %8 : i1 to i32
    %c0_i32_4 = arith.constant 0 : i32
    %10 = arith.cmpi ne, %9, %c0_i32_4 : i32
    scf.if %10 {
      %c0 = arith.constant 0 : index
      %c0_5 = arith.constant 0 : index
      %11 = vector.load %arg6[%c0, %c0_5] : memref<32x128xf32, #tpu.memory_space<vmem>>, vector<32x128xf32>
      %12 = vector.shape_cast %11 : vector<32x128xf32> to vector<1x32x128xf32>
      %cst = arith.constant dense<0.000000e+00> : vector<1xf32>
      %13 = vector.multi_reduction <add>, %12, %cst [1, 2] : vector<1x32x128xf32> to vector<1xf32>
      %14 = vector.shape_cast %13 : vector<1xf32> to vector<1x1x1xf32>
      %15 = vector.extract %14[0, 0, 0] : f32 from vector<1x1x1xf32>
      %c0_6 = arith.constant 0 : index
      %c0_7 = arith.constant 0 : index
      %16 = memref.load %arg5[%c0_6, %c0_7] : memref<1x3xf32, #tpu.memory_space<smem>>
      memref.store %15, %arg5[%c0_6, %c0_7] : memref<1x3xf32, #tpu.memory_space<smem>>
      %c0_8 = arith.constant 0 : index
      %c0_9 = arith.constant 0 : index
      %17 = vector.load %arg7[%c0_8, %c0_9] : memref<32x128xf32, #tpu.memory_space<vmem>>, vector<32x128xf32>
      %18 = vector.shape_cast %17 : vector<32x128xf32> to vector<1x32x128xf32>
      %cst_10 = arith.constant dense<0.000000e+00> : vector<1xf32>
      %19 = vector.multi_reduction <add>, %18, %cst_10 [1, 2] : vector<1x32x128xf32> to vector<1xf32>
      %20 = vector.shape_cast %19 : vector<1xf32> to vector<1x1x1xf32>
      %21 = vector.extract %20[0, 0, 0] : f32 from vector<1x1x1xf32>
      %c0_11 = arith.constant 0 : index
      %c1 = arith.constant 1 : index
      %22 = memref.load %arg5[%c0_11, %c1] : memref<1x3xf32, #tpu.memory_space<smem>>
      memref.store %21, %arg5[%c0_11, %c1] : memref<1x3xf32, #tpu.memory_space<smem>>
      %c0_12 = arith.constant 0 : index
      %c0_13 = arith.constant 0 : index
      %23 = vector.load %arg8[%c0_12, %c0_13] : memref<32x128xf32, #tpu.memory_space<vmem>>, vector<32x128xf32>
      %24 = vector.shape_cast %23 : vector<32x128xf32> to vector<1x32x128xf32>
      %cst_14 = arith.constant dense<0.000000e+00> : vector<1xf32>
      %25 = vector.multi_reduction <add>, %24, %cst_14 [1, 2] : vector<1x32x128xf32> to vector<1xf32>
      %26 = vector.shape_cast %25 : vector<1xf32> to vector<1x1x1xf32>
      %27 = vector.extract %26[0, 0, 0] : f32 from vector<1x1x1xf32>
      %c0_15 = arith.constant 0 : index
      %c2 = arith.constant 2 : index
      %28 = memref.load %arg5[%c0_15, %c2] : memref<1x3xf32, #tpu.memory_space<smem>>
      memref.store %27, %arg5[%c0_15, %c2] : memref<1x3xf32, #tpu.memory_space<smem>>
    } else {
    }
    return
  }
  func.func @transform_0(%arg0: i32, %arg1: i32) -> (i32, i32) {
    %c1_i32 = arith.constant 1 : i32
    %0 = arith.muli %arg0, %c1_i32 : i32
    %1 = arith.addi %0, %arg1 : i32
    %c0_i32 = arith.constant 0 : i32
    %2 = arith.minsi %1, %c0_i32 : i32
    %c0_i32_0 = arith.constant 0 : i32
    %c0_i32_1 = arith.constant 0 : i32
    return %2, %c0_i32_0 : i32, i32
  }
  func.func @transform_1(%arg0: i32, %arg1: i32) -> (i32, i32) {
    %c1_i32 = arith.constant 1 : i32
    %0 = arith.muli %arg0, %c1_i32 : i32
    %1 = arith.addi %0, %arg1 : i32
    %c0_i32 = arith.constant 0 : i32
    %2 = arith.minsi %1, %c0_i32 : i32
    %c0_i32_0 = arith.constant 0 : i32
    %c0_i32_1 = arith.constant 0 : i32
    return %2, %c0_i32_0 : i32, i32
  }
  func.func @transform_2(%arg0: i32, %arg1: i32) -> (i32, i32) {
    %c1_i32 = arith.constant 1 : i32
    %0 = arith.muli %arg0, %c1_i32 : i32
    %1 = arith.addi %0, %arg1 : i32
    %c0_i32 = arith.constant 0 : i32
    %2 = arith.minsi %1, %c0_i32 : i32
    %c0_i32_0 = arith.constant 0 : i32
    %c0_i32_1 = arith.constant 0 : i32
    return %2, %c0_i32_0 : i32, i32
  }
  func.func @transform_3(%arg0: i32, %arg1: i32) -> (i32, i32) {
    %c0_i32 = arith.constant 0 : i32
    %c0_i32_0 = arith.constant 0 : i32
    return %arg0, %c0_i32 : i32, i32
  }
}

</mosaic_0001>

<bundles_post_ra>
// kernel: _masked_sig_stats.1
= control target key start
LH: loop header
LB: loop body
LE: loop exit
PB: predicated region body
PF: predicated region fallthrough
CT: control target
= control target key end

     0   :  { %v389_v13 = vmov 0   ;;  %s474_s0 = inlined_call_operand.vmem [shape: f32[32,128], index: 0, kind: input, shape index: {}]   ;;  %s475_s1 = inlined_call_operand.vmem [shape: f32[32,128], index: 1, kind: input, shape index: {}]   ;;  %s476_s2 = inlined_call_operand.vmem [shape: u8[32,128], index: 2, kind: input, shape index: {}]   ;;  %s477_s3 = inlined_call_operand.vmem [shape: f32[1,3], index: 3, kind: output, shape index: {}]  }
   0x1   :  { %v133_v0 = vld [vmem:[%s475_s1] sm:$0xff]  ;;  %v134_v1 = vld [vmem:[%s475_s1 + $0x8] sm:$0xff]  ;;  %v135_v2 = vld [vmem:[%s475_s1 + $0x10] sm:$0xff] }
   0x2   :  { %v136_v3 = vld [vmem:[%s475_s1 + $0x18] sm:$0xff]  ;;  %v137_v4 = vld [vmem:[%s476_s2] sm:$0xff]  ;;  %vm139_vm0 = vcmp.gt.f32.partialorder %v133_v0, 0.0  ;;  %vm140_vm1 = vcmp.gt.f32.partialorder %v134_v1, 0.0  ;;  %vm141_vm2 = vcmp.gt.f32.partialorder %v135_v2, 0.0  ;;  %v130_v6 = vld [vmem:[%s474_s0 + $0x8] sm:$0xff] }
   0x3   :  { %v129_v5 = vld [vmem:[%s474_s0] sm:$0xff]  ;;  %vm138_vm3 = vnez %v137_v4  ;;  %vm142_vm4 = vcmp.gt.f32.partialorder %v136_v3, 0.0  ;;  %vm143_vm5 = vmpackc.low %vm140_vm1, %vm139_vm0  ;;  %v131_v7 = vld [vmem:[%s474_s0 + $0x10] sm:$0xff]  ;;  %v148_v10 = vadd.f32 0.001, %v130_v6 }
   0x4   :  { %v147_v8 = vadd.f32 0.001, %v129_v5  ;;  %vm144_vm6 = vmpackc.low %vm142_vm4, %vm141_vm2  ;;  %v132_v9 = vld [vmem:[%s474_s0 + $0x18] sm:$0xff]  ;;  %v149_v11 = vadd.f32 0.001, %v131_v7 }
   0x5   :  { %vm145_vm7 = vmpackc.even %vm144_vm6, %vm143_vm5  ;;  %v150_v12 = vadd.f32 0.001, %v132_v9  ;;  %v159_v15 = vadd.f32 0.001, %v133_v0 }
   0x6   :  { %359 = vlog2.f32 %v147_v8  ;;  %vm146_vm8 = vmand %vm138_vm3, %vm145_vm7 }
   0x7   :  { %361 = vlog2.f32 %v148_v10  ;;  %v175_v14 = vsel %vm146_vm8, 16843009, %v389_v13 }
   0x8   :  { %363 = vlog2.f32 %v149_v11 }
   0x9   :  { %8 = vsyncpa [#allocation6], 0  ;;  %v176_v16 = vunpack.c.0.s8 %v175_v14  ;;  %v177_v17 = vunpack.c.1.s8 %v175_v14  ;;  %v178_v18 = vunpack.c.2.s8 %v175_v14  ;;  %v179_v19 = vunpack.c.3.s8 %v175_v14  ;;  %s319_s30 = sshll.u32 %s477_s3, 4  ;;  %s320_s30 = int_to_ptr.vmem [resolvable:$true] %s319_s30 }
   0xa   :  { %365 = vlog2.f32 %v150_v12  ;;  %v160_v20 = vadd.f32 0.001, %v134_v1  ;;  %v161_v25 = vadd.f32 0.001, %v135_v2  ;;  %v162_v30 = vadd.f32 0.001, %v136_v3  ;;  %p380_p1 = scmp.lt.s32.totalorder %s320_s30, %s320_s30 }
   0xb   :  { %v180_v21 = vpack.c.b16 %v176_v16, %v176_v16  ;;  %v182_v22 = vpack.c.b16 %v177_v17, %v177_v17  ;;  %v184_v23 = vpack.c.b16 %v178_v18, %v178_v18  ;;  %v186_v24 = vpack.c.b16 %v179_v19, %v179_v19  ;;  %s375_s6 = scalar_lea.vmem %s320_s30, 16 }
   0xc   :  { %367 = vlog2.f32 %v159_v15  ;;  %v390_v47 = vmov 0.0   ;;  %p376_p0 = scmp.ne.s32.totalorder %s320_s30, %s375_s6  ;;  %p381_p2 = scmp.lt.s32.totalorder %s375_s6, %s375_s6 }
   0xd   :  { %v181_v26 = vpack.c.b8 %v180_v21, %v180_v21  ;;  %v183_v27 = vpack.c.b8 %v182_v22, %v182_v22  ;;  %v185_v28 = vpack.c.b8 %v184_v23, %v184_v23  ;;  %v187_v29 = vpack.c.b8 %v186_v24, %v186_v24 }
   0xe   :  { %369 = vlog2.f32 %v160_v20  ;;  %p382_p3 = por %p381_p2, %p380_p1 }
   0xf   :  { %vm188_vm9 = vnez %v181_v26  ;;  %vm189_vm10 = vnez %v183_v27  ;;  %vm190_vm11 = vnez %v185_v28  ;;  %vm191_vm12 = vnez %v187_v29 }
  0x10   :  { %v360_v31 = vpop.eup %359  ;;  %v192_v32 = vsel %vm188_vm9, 16843009, %v389_v13  ;;  %v193_v33 = vsel %vm189_vm10, 16843009, %v389_v13  ;;  %v194_v34 = vsel %vm190_vm11, 16843009, %v389_v13  ;;  %371 = vlog2.f32 %v161_v25  ;;  %p383_p4 = pnand %p382_p3, %p376_p0 }
  0x11   :  { %v362_v35 = vpop.eup %361  ;;  %v195_v36 = vsel %vm191_vm12, 16843009, %v389_v13  ;;  %v196_v37 = vunpack.c.0.s8 %v192_v32  ;;  %v197_v38 = vunpack.c.0.s8 %v193_v33  ;;  %v198_v39 = vunpack.c.0.s8 %v194_v34 }
  0x12   :  { %v364_v40 = vpop.eup %363  ;;  %v199_v41 = vunpack.c.0.s8 %v195_v36  ;;  %373 = vlog2.f32 %v162_v30  ;;  %v152_v52 = vmul.f32 0.6931472, %v360_v31  ;;  %v154_v56 = vmul.f32 0.6931472, %v362_v35 }
  0x13   :  { %vm439_vm13 = vcmp.ne.s32.totalorder %v196_v37, 0  ;;  %vm443_vm14 = vcmp.ne.s32.totalorder %v197_v38, 0  ;;  %vm447_vm15 = vcmp.ne.s32.totalorder %v198_v39, 0  ;;  %v156_v60 = vmul.f32 0.6931472, %v364_v40 }
  0x14   :  { %v366_v45 = vpop.eup %365  ;;  %vm451_vm0 = vcmp.ne.s32.totalorder %v199_v41, 0  ;;  %v346_v48 = vsel %vm439_vm13, 1.0, %v390_v47  ;;  %v347_v49 = vsel %vm443_vm14, 1.0, %v390_v47  ;;  %v348_v50 = vsel %vm447_vm15, 1.0, %v390_v47 }
  0x15   :  { %v263_v51 = vadd.f32 %v347_v49, %v346_v48  ;;  %v349_v54 = vsel %vm451_vm0, 1.0, %v390_v47  ;;  %v158_v0 = vmul.f32 0.6931472, %v366_v45 }
  0x16   :  { %v368_v53 = vpop.eup %367 }
  0x17   :  { %v264_v55 = vadd.f32 %v348_v50, %v263_v51  ;;  %v164_v57 = vmul.f32 0.6931472, %v368_v53 }
  0x18   :  { %v370_v58 = vpop.eup %369 }
  0x19   :  { %v265_v59 = vadd.f32 %v349_v54, %v264_v55  ;;  %v166_v61 = vmul.f32 0.6931472, %v370_v58  ;;  %v171_v62 = vsub.f32 %v152_v52, %v164_v57 }
  0x1a   :  { %v372_v63 = vpop.eup %371 }
  0x1b   :  { %266 = vadd.xlane.f32.xlu0 %v265_v59  ;;  %v168_v1 = vmul.f32 0.6931472, %v372_v63  ;;  %v172_v2 = vsub.f32 %v154_v56, %v166_v61  ;;  %v204_v3 = vsel %vm439_vm13, %v171_v62, 0.0 }
  0x1c   :  { %v374_v4 = vpop.eup %373  ;;  %v216_v5 = vmul.f32 %v204_v3, %v204_v3 }
  0x1d   :  { %v170_v6 = vmul.f32 0.6931472, %v374_v4  ;;  %v173_v7 = vsub.f32 %v156_v60, %v168_v1  ;;  %v205_v8 = vsel %vm443_vm14, %v172_v2, 0.0 }
  0x1e   :  { %v217_v9 = vmul.f32 %v205_v8, %v205_v8  ;;  %v281_v10 = vadd.f32 %v205_v8, %v204_v3 }
  0x1f   :  { %v174_v11 = vsub.f32 %v158_v0, %v170_v6  ;;  %v206_v12 = vsel %vm447_vm15, %v173_v7, 0.0 }
  0x20   :  { %v218_v13 = vmul.f32 %v206_v12, %v206_v12  ;;  %v299_v14 = vadd.f32 %v217_v9, %v216_v5  ;;  %v282_v15 = vadd.f32 %v281_v10, %v206_v12 }
  0x21   :  { %v207_v16 = vsel %vm451_vm0, %v174_v11, 0.0 }
  0x22   :  { %v219_v17 = vmul.f32 %v207_v16, %v207_v16  ;;  %v300_v18 = vadd.f32 %v299_v14, %v218_v13  ;;  %v283_v19 = vadd.f32 %v282_v15, %v207_v16 }
  0x24   :  { %v301_v20 = vadd.f32 %v300_v18, %v219_v17  ;;  %284 = vadd.xlane.f32.xlu0 %v283_v19 }
  0x26   :  { %302 = vadd.xlane.f32.xlu1 %v301_v20 }
  0xa8   :  { %v267_v21 = vpop.xlane.xlu0 %266 }
  0xa9   :  { %v268_v22 = vrot.slane %v267_v21, 4 }
  0xab   :  { %v269_v23 = vadd.f32 %v268_v22, %v267_v21 }
  0xad   :  { %v270_v24 = vrot.slane %v269_v23, 2 }
  0xaf   :  { %v271_v25 = vadd.f32 %v270_v24, %v269_v23 }
  0xb1   :  { %v285_v26 = vpop.xlane.xlu0 %284  ;;  %v272_v27 = vrot.slane %v271_v25, 1 }
  0xb2   :  { %v286_v28 = vrot.slane %v285_v26, 4 }
  0xb3   :  { %v303_v29 = vpop.xlane.xlu1 %302  ;;  %v273_v30 = vadd.f32 %v272_v27, %v271_v25 }
  0xb4   :  { %v304_v31 = vrot.slane %v303_v29, 4  ;;  %v287_v32 = vadd.f32 %v286_v28, %v285_v26 }
  0xb5   :  { %350 = vpush %v273_v30 }
  0xb6   :  { %v305_v33 = vadd.f32 %v304_v31, %v303_v29  ;;  %v288_v34 = vrot.slane %v287_v32, 2 }
  0xb8   :  { %v306_v35 = vrot.slane %v305_v33, 2  ;;  %v289_v36 = vadd.f32 %v288_v34, %v287_v32 }
  0xba   :  { %v307_v37 = vadd.f32 %v306_v35, %v305_v33  ;;  %v290_v38 = vrot.slane %v289_v36, 1 }
  0xbc   :  { %v291_v39 = vadd.f32 %v290_v38, %v289_v36  ;;  %v308_v40 = vrot.slane %v307_v37, 1 }
  0xbe   :  { %352 = vpush %v291_v39  ;;  %v309_v41 = vadd.f32 %v308_v40, %v307_v37 }
  0xc0   :  { %354 = vpush %v309_v41 }
  0xe6   :  { %s351_s0 = spop %350 }
  0xe7   :  { %276 = sst [smem:[#allocation5]] %s351_s0 }
  0xef   :  { %s353_s4 = spop %352 }
  0xf0   :  { %294 = sst [smem:[#allocation5 + $0x1]] %s353_s4 }
  0xf1   :  { %s355_s5 = spop %354 }
  0xf2   :  { %312 = sst [smem:[#allocation5 + $0x2]] %s355_s5 }
  0xf3   :  { %386 = shalt.err (!%p383_p4)
}
  0xf4   :  { %s391_s7 = smov [#allocation5]  }
  0xf5   :  { %322 = dma.smem_to_vmem %s391_s7, 16, %s320_s30, [#allocation6]  }
  0xf6   :  { %387 = dma.done.wait [#allocation6], 16  }
  0xf7   :  { %388 = vsyncadd [#allocation6], 4294967280 }
  0xf8   :  { %326 = sfence }
  0xf9   :  { %327 = vsyncpa [#allocation6], 1 }

</bundles_post_ra>
